<compile_context>
chip_gen: v7x
topology: tpu7x:2x2x1
jax: 0.10.0
libtpu: 0.0.40
codegen_flags: <defaults>
</compile_context>

<pallas_src>
import jax
import jax.numpy as jnp
from jax import lax
from jax.experimental import pallas as pl
from jax.experimental.pallas import tpu as pltpu


def ca_layer_kernel(x_ref, w1t_ref, b1_ref, w2t_ref, b2_ref, o_ref):
    # x_ref:   (Bt, C, HW)  lane-dense spatial axis
    # w1t_ref: (C, Cr)   b1_ref: (1, Cr)
    # w2t_ref: (Cr, C)   b2_ref: (1, C)
    # o_ref:   (Bt, C, HW)
    x = x_ref[...]
    hw = x.shape[-1]
    xf = x.astype(jnp.float32)

    # Global average pool over the lane axis; f32 accumulation.
    pooled = jnp.sum(xf, axis=-1) * (1.0 / hw)                      # (Bt, C)

    # FC1 (1x1 conv C -> Cr) + ReLU on the otherwise-idle MXU.
    z = jnp.dot(pooled, w1t_ref[...].astype(jnp.float32),
                preferred_element_type=jnp.float32,
                precision=lax.Precision.HIGHEST)                    # (Bt, Cr)
    z = jnp.maximum(z + b1_ref[...].astype(jnp.float32), 0.0)

    # FC2 (1x1 conv Cr -> C) + Sigmoid, same MXU path (EUP does the sigmoid).
    y = jnp.dot(z, w2t_ref[...].astype(jnp.float32),
                preferred_element_type=jnp.float32,
                precision=lax.Precision.HIGHEST)                    # (Bt, C)
    y = jax.nn.sigmoid(y + b2_ref[...].astype(jnp.float32))

    # Per-channel scale in f32 (matches the f32 reference ordering even for
    # bf16 inputs); cast only at the lane-dense store.
    o_ref[...] = (xf * y[:, :, None]).astype(o_ref.dtype)


def _vmem_capacity_bytes():
    try:
        info = pltpu.get_tpu_info()
        cap = getattr(info, "vmem_capacity_bytes", None)
        if cap:
            return int(cap)
    except Exception:
        pass
    return 64 * 1024 * 1024  # conservative fallback: v7x per-TensorCore VMEM


def ca_layer(x, w1, b1, w2, b2, *, donate_x=False):
    """x: (B, C, H, W); w1: (Cr, C); b1: (Cr,); w2: (C, Cr); b2: (C,)."""
    B, C, H, W = x.shape
    Cr = w1.shape[0]
    HW = H * W

    # Lane-dense layout + pre-transposed FC weights (no in-kernel transposes).
    x3 = x.reshape(B, C, HW)
    w1t = w1.T                      # (C, Cr)
    w2t = w2.T                      # (Cr, C)
    b1_2d = b1.reshape(1, Cr)
    b2_2d = b2.reshape(1, C)

    itemsize = jnp.dtype(x.dtype).itemsize
    bytes_per_image = C * HW * itemsize

    vmem_cap = _vmem_capacity_bytes()
    # ~4 MiB blocks already sit at ~85% of HBM roofline; allow bigger blocks on
    # 128 MiB-VMEM parts (v5e/v6e).
    target_block = (4 if vmem_cap <= 64 * 1024 * 1024 else 8) * 1024 * 1024

    # Batch tile Bt:
    #  * keep the grid >= min(B, 8) steps so in/out DMAs of neighbouring steps
    #    overlap and the 'parallel' axis shards across v7x's two TensorCores,
    #  * keep each (Bt, C, HW) block near target_block,
    #  * Bt need not divide B: grid uses pl.cdiv, Pallas handles the tail.
    min_grid = min(B, 8)
    bt_for_grid = max(1, B // min_grid)
    bt_for_budget = max(1, target_block // bytes_per_image)
    Bt = int(max(1, min(bt_for_grid, bt_for_budget)))
    grid = (pl.cdiv(B, Bt),)

    # VMEM limit: in+out blocks double-buffered (4x block) plus weight/temp
    # margin, capped generation-aware with headroom for Mosaic scratch. If a
    # single image (Bt=1) is oversized, the limit scales up to the cap.
    block_bytes = Bt * bytes_per_image
    vmem_limit = max(4 * block_bytes + (2 << 20), 16 << 20)
    vmem_limit = int(min(vmem_limit, max(vmem_cap - (16 << 20), 32 << 20)))

    kwargs = {}
    if donate_x:
        # Only valid when the caller no longer needs x (NOT inside RCAB, where
        # the CA input is also the residual branch).
        kwargs["input_output_aliases"] = {0: 0}

    out3 = pl.pallas_call(
        ca_layer_kernel,
        out_shape=jax.ShapeDtypeStruct((B, C, HW), x.dtype),
        grid_spec=pltpu.PrefetchScalarGridSpec(
            num_scalar_prefetch=0,
            grid=grid,
            in_specs=[
                pl.BlockSpec((Bt, C, HW), lambda b: (b, 0, 0)),
                pl.BlockSpec((C, Cr), lambda b: (0, 0)),
                pl.BlockSpec((1, Cr), lambda b: (0, 0)),
                pl.BlockSpec((Cr, C), lambda b: (0, 0)),
                pl.BlockSpec((1, C), lambda b: (0, 0)),
            ],
            out_specs=pl.BlockSpec((Bt, C, HW), lambda b: (b, 0, 0)),
        ),
        compiler_params=pltpu.CompilerParams(
            dimension_semantics=("parallel",),
            vmem_limit_bytes=vmem_limit,
        ),
        **kwargs,
    )(x3, w1t, b1_2d, w2t, b2_2d)

    return out3.reshape(B, C, H, W)


def ca_layer_ref(x, w1, b1, w2, b2):
    """Pure-JAX reference matching the PyTorch forward."""
    pooled = jnp.mean(x.astype(jnp.float32), axis=(2, 3))                 # (B, C)
    z = jnp.maximum(
        jnp.dot(pooled, w1.T, precision=lax.Precision.HIGHEST) + b1, 0.0)  # (B, Cr)
    y = jax.nn.sigmoid(
        jnp.dot(z, w2.T, precision=lax.Precision.HIGHEST) + b2)            # (B, C)
    return (x.astype(jnp.float32) * y[:, :, None, None]).astype(x.dtype)


def _run_case(key, B, C, H, W, reduction):
    Cr = C // reduction
    kx, kw1, kb1, kw2, kb2 = jax.random.split(key, 5)
    x = jax.random.normal(kx, (B, C, H, W), dtype=jnp.float32)
    # Conv2d 1x1 weights (out, in, 1, 1) collapse to (out, in) matrices.
    w1 = jax.random.normal(kw1, (Cr, C), dtype=jnp.float32) * 0.1
    b1 = jax.random.normal(kb1, (Cr,), dtype=jnp.float32) * 0.1
    w2 = jax.random.normal(kw2, (C, Cr), dtype=jnp.float32) * 0.1
    b2 = jax.random.normal(kb2, (C,), dtype=jnp.float32) * 0.1

    out = jax.block_until_ready(ca_layer(x, w1, b1, w2, b2))
    ref = ca_layer_ref(x, w1, b1, w2, b2)
    assert out.shape == (B, C, H, W)
    assert jnp.allclose(out, ref, atol=1e-5, rtol=1e-5), (
        f"mismatch vs reference at B={B}")


if __name__ == "__main__":
    key = jax.random.PRNGKey(0)
    k1, k2 = jax.random.split(key)

    # Canonical small case (channel >= reduction so C//r >= 1).
    _run_case(k1, B=2, C=64, H=16, W=16, reduction=16)
    # Non-divisible batch: exercises the pl.cdiv grid / padded tail block path.
    _run_case(k2, B=17, C=64, H=16, W=16, reduction=16)

    print("KERNEL_OK")
</pallas_src>

<mosaic_0001>
module attributes {stable_mosaic.version = 11 : i64} {
  func.func @ca_layer_kernel(%arg0: i32, %arg1: memref<1x64x256xf32, #tpu.memory_space<vmem>>, %arg2: memref<64x4xf32, #tpu.memory_space<vmem>>, %arg3: memref<1x4xf32, #tpu.memory_space<vmem>>, %arg4: memref<4x64xf32, #tpu.memory_space<vmem>>, %arg5: memref<1x64xf32, #tpu.memory_space<vmem>>, %arg6: memref<1x64x256xf32, #tpu.memory_space<vmem>>) attributes {dimension_semantics = [#tpu.dimension_semantics<parallel>], iteration_bounds = array<i64: 2>, scalar_prefetch = 0 : i64, scratch_operands = 0 : i64, tpu.core_type = #tpu.core_type<tc>, window_params = [{transform_indices = @transform_0, window_bounds = array<i64: 1, 64, 256>}, {pipeline_mode = #tpu.pipeline_mode<synchronous>, transform_indices = @transform_1, window_bounds = array<i64: 64, 4>}, {pipeline_mode = #tpu.pipeline_mode<synchronous>, transform_indices = @transform_2, window_bounds = array<i64: 1, 4>}, {pipeline_mode = #tpu.pipeline_mode<synchronous>, transform_indices = @transform_3, window_bounds = array<i64: 4, 64>}, {pipeline_mode = #tpu.pipeline_mode<synchronous>, transform_indices = @transform_4, window_bounds = array<i64: 1, 64>}, {transform_indices = @transform_5, window_bounds = array<i64: 1, 64, 256>}]} {
    %c0 = arith.constant 0 : index
    %c0_0 = arith.constant 0 : index
    %c0_1 = arith.constant 0 : index
    %0 = vector.load %arg1[%c0, %c0_0, %c0_1] : memref<1x64x256xf32, #tpu.memory_space<vmem>>, vector<1x64x256xf32>
    %cst = arith.constant dense<0.000000e+00> : vector<1x64xf32>
    %1 = vector.multi_reduction <add>, %0, %cst [2] : vector<1x64x256xf32> to vector<1x64xf32>
    %cst_2 = arith.constant 3.906250e-03 : f32
    %2 = vector.broadcast %cst_2 : f32 to vector<1x64xf32>
    %3 = arith.mulf %1, %2 : vector<1x64xf32>
    %c0_3 = arith.constant 0 : index
    %c0_4 = arith.constant 0 : index
    %4 = vector.load %arg2[%c0_3, %c0_4] : memref<64x4xf32, #tpu.memory_space<vmem>>, vector<64x4xf32>
    %cst_5 = arith.constant dense<0.000000e+00> : vector<1x4xf32>
    %5 = tpu.matmul %3, %4, %cst_5 {dimension_numbers = #tpu.dot_dimension_numbers<[1], [0], [0], [1], [0, 0, 1, 1], [], []>, precision = #tpu.contract_precision<fp32>} : vector<1x64xf32>, vector<64x4xf32>, vector<1x4xf32> -> vector<1x4xf32>
    %c0_6 = arith.constant 0 : index
    %c0_7 = arith.constant 0 : index
    %6 = vector.load %arg3[%c0_6, %c0_7] : memref<1x4xf32, #tpu.memory_space<vmem>>, vector<1x4xf32>
    %7 = arith.addf %5, %6 : vector<1x4xf32>
    %cst_8 = arith.constant 0.000000e+00 : f32
    %8 = vector.broadcast %cst_8 : f32 to vector<1x4xf32>
    %9 = arith.maximumf %7, %8 : vector<1x4xf32>
    %c0_9 = arith.constant 0 : index
    %c0_10 = arith.constant 0 : index
    %10 = vector.load %arg4[%c0_9, %c0_10] : memref<4x64xf32, #tpu.memory_space<vmem>>, vector<4x64xf32>
    %cst_11 = arith.constant dense<0.000000e+00> : vector<1x64xf32>
    %11 = tpu.matmul %9, %10, %cst_11 {dimension_numbers = #tpu.dot_dimension_numbers<[1], [0], [0], [1], [0, 0, 1, 1], [], []>, precision = #tpu.contract_precision<fp32>} : vector<1x4xf32>, vector<4x64xf32>, vector<1x64xf32> -> vector<1x64xf32>
    %c0_12 = arith.constant 0 : index
    %c0_13 = arith.constant 0 : index
    %12 = vector.load %arg5[%c0_12, %c0_13] : memref<1x64xf32, #tpu.memory_space<vmem>>, vector<1x64xf32>
    %13 = arith.addf %11, %12 : vector<1x64xf32>
    %14 = arith.negf %13 : vector<1x64xf32>
    %15 = math.exp %14 : vector<1x64xf32>
    %cst_14 = arith.constant 1.000000e+00 : f32
    %16 = vector.broadcast %cst_14 : f32 to vector<1x64xf32>
    %17 = arith.addf %16, %15 : vector<1x64xf32>
    %18 = arith.divf %16, %17 : vector<1x64xf32>
    %19 = vector.shape_cast %18 : vector<1x64xf32> to vector<1x64x1xf32>
    %20 = vector.broadcast %19 : vector<1x64x1xf32> to vector<1x64x256xf32>
    %21 = arith.mulf %0, %20 : vector<1x64x256xf32>
    %c0_15 = arith.constant 0 : index
    %c0_16 = arith.constant 0 : index
    %c0_17 = arith.constant 0 : index
    %22 = vector.load %arg6[%c0_15, %c0_16, %c0_17] : memref<1x64x256xf32, #tpu.memory_space<vmem>>, vector<1x64x256xf32>
    tpu.vector_store %arg6[%c0_15, %c0_16, %c0_17], %21 {strides = array<i32>} : memref<1x64x256xf32, #tpu.memory_space<vmem>>, vector<1x64x256xf32>,
    return
  }
  func.func @transform_0(%arg0: i32) -> (i32, i32, i32) {
    %c0_i32 = arith.constant 0 : i32
    %c0_i32_0 = arith.constant 0 : i32
    %c0_i32_1 = arith.constant 0 : i32
    return %arg0, %c0_i32, %c0_i32_0 : i32, i32, i32
  }
  func.func @transform_1(%arg0: i32) -> (i32, i32) {
    %c0_i32 = arith.constant 0 : i32
    %c0_i32_0 = arith.constant 0 : i32
    %c0_i32_1 = arith.constant 0 : i32
    return %c0_i32, %c0_i32_0 : i32, i32
  }
  func.func @transform_2(%arg0: i32) -> (i32, i32) {
    %c0_i32 = arith.constant 0 : i32
    %c0_i32_0 = arith.constant 0 : i32
    %c0_i32_1 = arith.constant 0 : i32
    return %c0_i32, %c0_i32_0 : i32, i32
  }
  func.func @transform_3(%arg0: i32) -> (i32, i32) {
    %c0_i32 = arith.constant 0 : i32
    %c0_i32_0 = arith.constant 0 : i32
    %c0_i32_1 = arith.constant 0 : i32
    return %c0_i32, %c0_i32_0 : i32, i32
  }
  func.func @transform_4(%arg0: i32) -> (i32, i32) {
    %c0_i32 = arith.constant 0 : i32
    %c0_i32_0 = arith.constant 0 : i32
    %c0_i32_1 = arith.constant 0 : i32
    return %c0_i32, %c0_i32_0 : i32, i32
  }
  func.func @transform_5(%arg0: i32) -> (i32, i32, i32) {
    %c0_i32 = arith.constant 0 : i32
    %c0_i32_0 = arith.constant 0 : i32
    %c0_i32_1 = arith.constant 0 : i32
    return %arg0, %c0_i32, %c0_i32_0 : i32, i32, i32
  }
}

</mosaic_0001>

<bundles_post_ra>
// kernel: tpu_custom_call.1
= control target key start
LH: loop header
LB: loop body
LE: loop exit
PB: predicated region body
PF: predicated region fallthrough
CT: control target
= control target key end

     0   :  { %10 = vsyncpa [#allocation3], 0  ;;  %s2446_s0 = inlined_call_operand.hbm [shape: f32[2,64,256], index: 0, kind: input, shape index: {}]   ;;  %s2447_s1 = inlined_call_operand.vmem [shape: f32[64,4], index: 1, kind: input, shape index: {}]   ;;  %s2448_s2 = inlined_call_operand.vmem [shape: f32[1,4], index: 2, kind: input, shape index: {}]   ;;  %s2449_s3 = inlined_call_operand.vmem [shape: f32[4,64], index: 3, kind: input, shape index: {}]   ;;  %s2450_s4 = inlined_call_operand.vmem [shape: f32[1,64], index: 4, kind: input, shape index: {}]   ;;  %s2451_s5 = inlined_call_operand.hbm [shape: f32[2,64,256], index: 5, kind: output, shape index: {}]  }
   0x1   :  { %12 = vsyncpa [#allocation3 + $0x1], 0 }
   0x2   :  { %13 = vsyncpa [#allocation4], 0 }
   0x3   :  { %15 = vsyncpa [#allocation4 + $0x1], 0  ;;  %s2034_s18 = smov 0   ;;  %s2036_s19 = smov 0  }
   0x4   :  { %s2038_s20 = smov 0   ;;  %s2040_s21 = smov 0  }
   0x5 LB: > { %s2055_s22 = sadd.s32 4294967295, %s1993_s21   ;;  %s1520_s23 = sadd.s32 4294967294, %s1993_s21   ;;  %s1993_s21 = sphi %s2040_s21, %s2464_s21   ;;  %s1989_s20 = sphi %s2038_s20, %s2463_s20   ;;  %s1985_s19 = sphi %s2036_s19, %s2462_s19   ;;  %s1981_s18 = sphi %s2034_s18, %s2461_s18  }
   0x6   : > { %s2059_s24 = sadd.s32 1, %s1993_s21   ;;  %s28_s25 = sadd.s32 1, %s1989_s20 }
   0x7   : > { %s25_s26 = ssub.s32 %s1993_s21, %s2059_s24  ;;  %p35_p0 = scmp.ne.s32.totalorder %s1989_s20, %s1985_s19 }
   0x8   : > { %p26_p1 = scmp.eq.s32.totalorder %s25_s26, 0  ;;  %p36_p2 = scmp.eq.s32.totalorder %s1993_s21, 0 }
   0x9   : > { %p41_p3 = scmp.ne.s32.totalorder %s1985_s19, %s1981_s18  ;;  %p42_p4 = scmp.eq.s32.totalorder %s2055_s22, 0 }
   0xa   : > { %s2071_s27 = scalar_select %p26_p1, %s1989_s20, %s28_s25  }
   0xb   : > { %p2073_p5 = por %p36_p2, %p35_p0  ;;  %p2077_p6 = por %p42_p4, %p41_p3 }
   0xc   : > { %p149_p7 = scmp.eq.s32.totalorder %s2055_s22, 1  ;;  %p155_p8 = scmp.eq.s32.totalorder %s1520_s23, 1 }
   0xd   : > { %p1852_p10 = scmp.lt.s32.totalorder %s1993_s21, 2  ;;  %s187_s7 = sand.u32 1, %s1989_s20  }
   0xe   : > { %p2084_p11 = por %p149_p7, %p35_p0  ;;  %p2088_p12 = por %p155_p8, %p41_p3 }
   0xf   : > { %s1535_s8 = sshll.u32 %s1993_s21, 11  ;;  %s1523_s9 = sshll.u32 %s187_s7, 7 }
  0x10   : > { %s2455_s30 = scalar_select %p2084_p11, 1, 0 }
  0x11   : > { %s2456_s6 = scalar_select %p2088_p12, 1, 0 }
  0x12   : > { %s2097_s12 = scalar_lea.hbm %s2446_s0, %s1535_s8  ;;  %s191_s13 = scalar_lea.vmem [#allocation2], %s1523_s9 }
  0x13   : > { %s198_s14 = sshll.u32 %s191_s13, 4  ;;  %p2101_p13 = pnand %p1852_p10, %p2073_p5  ;;  %s2105_s14 = int_to_ptr.vmem [resolvable:$true] %s198_s14 }
  0x14   : > { %s2107_s16 = scalar_lea.sflag [#allocation3], %s187_s7  ;;  %s1897_s17 = scalar_lea.hbm %s2097_s12, 2048 }
  0x15   : > { %p1898_p0 = scmp.ne.s32.totalorder %s2097_s12, %s1897_s17  ;;  %p1899_p1 = pneg %p2101_p13 }
  0x16   : > { %s1902_s26 = scalar_lea.hbm %s2446_s0, 4096  ;;  %p1903_p4 = scmp.lt.u32.totalorder %s2097_s12, %s2446_s0 }
  0x17   : > { %p1900_p2 = pnand %p1899_p1, %p1898_p0  ;;  %p1904_p5 = scmp.lt.u32.totalorder %s1902_s26, %s1897_s17 }
  0x18   : > { %p1906_p8 = scmp.lt.u32.totalorder %s1897_s17, %s2097_s12 }
  0x19   : > { %p1901_p3 = pneg %p1900_p2  ;;  %p1905_p7 = por %p1904_p5, %p1903_p4 }
  0x1b   : > { %p1907_p10 = por %p1906_p8, %p1905_p7 }
  0x1d   : > { %p1908_p9 = pnand %p1907_p10, %p1901_p3 }
  0x1f   : > { %1911 = shalt.err (!%p1908_p9)
}
  0x20   : > { %s1912_s7 = scalar_lea.vmem %s2105_s14, 2048  ;;  %s1995_s9 = smov [#allocation2]  }
  0x21   : > { %p1913_p0 = scmp.ne.s32.totalorder %s2105_s14, %s1912_s7  ;;  %s1917_s10 = sshll.u32 %s1995_s9, 4  ;;  %s1918_s10 = int_to_ptr.vmem [resolvable:$false] %s1917_s10 }
  0x22   : > { %s1919_s11 = scalar_lea.vmem %s1918_s10, 4096  ;;  %p1920_p11 = scmp.lt.s32.totalorder %s2105_s14, %s1918_s10 }
  0x23   : > { %p1915_p2 = pnand %p1913_p0, %p1899_p1  ;;  %p1921_p4 = scmp.lt.s32.totalorder %s1919_s11, %s1912_s7 }
  0x25   : > { %p1916_p12 = pneg %p1915_p2  ;;  %p1922_p5 = por %p1921_p4, %p1920_p11 }
  0x27   : > { %p1923_p7 = pnand %p1922_p5, %p1916_p12 }
  0x29   : > { %1926 = shalt.err (!%p1923_p7)
}
  0x2a   : > { %s1996_s13 = smov 256   ;;  %s1997_s17 = smov 16  }
  0x2b   : > { %1847 = dma.hbm_to_vmem [thread:$0]  (!%p2101_p13), %s2097_s12, 2048, %s2105_s14, %s2107_s16, %s1996_s13, %s1996_s13, %s1997_s17  }
  0x2c   : > { %p1526_p9 = scmp.ge.s32.totalorder %s1993_s21, 1  ;;  %p206_p1 = scmp.lt.s32.totalorder %s1993_s21, 3 }
  0x2e   : > { %p207_p3 = pnand %p1526_p9, %p206_p1 }
  0x2f   : > { %s2138_s23 = sand.u32 (!%p207_p3), 1, %s1985_s19  }
  0x30   : > { %210 = sbr.rel (%p207_p3) target bundleno = 929 (0x3a1), region = 40  ;;  %s1527_s25 = sshll.u32 (!%p207_p3), %s2138_s23, 7 }
  0x31   : > { %s213_s26 = scalar_lea.sflag (!%p207_p3), [#allocation3], %s2138_s23  ;;  %s216_s28 = scalar_lea.vmem (!%p207_p3), [#allocation2], %s1527_s25 }
  0x37   : > { %1972 = dma.done.wait (%p2077_p6), %s213_s26, 2048  }
  0x38   : > { %1974 = vsyncadd (%p2077_p6), %s213_s26, 4294965248  ;;  %v2148_v0 = vld [vmem:[%s216_s28] sm:$0xff]  ;;  %v2150_v1 = vld [vmem:[%s216_s28 + $0x8] sm:$0xff]  ;;  %v1998_v34 = vmov 0.0|0.0   ;;  %vm1999_vm0 = vmmov 0   ;;  %v2000_v56 = vmov 0.0  }
  0x39   : > { %v2152_v2 = vld [vmem:[%s216_s28 + $0x20] sm:$0xff]  ;;  %v259_v3 = vadd.f32 %v2150_v1, %v2148_v0  ;;  %v2156_v4 = vld [vmem:[%s216_s28 + $0x28] sm:$0xff]  ;;  %v2158_v5 = vld [vmem:[%s216_s28 + $0x10] sm:$0xff]  ;;  %1771 = vmatprep.subr.bf16.mxu0 %v1998_v34  ;;  %1747 = vmatprep.subr.bf16.mxu1 %v1998_v34  ;;  %vm319_vm1 = vcmask 130112   ;;  %vm326_vm2 = vcmask 195712   ;;  %vm333_vm3 = vcmask 261312  }
  0x3a   : > { %v2160_v6 = vld [vmem:[%s216_s28 + $0x18] sm:$0xff]  ;;  %v265_v7 = vadd.f32 %v2156_v4, %v2152_v2  ;;  %v2164_v8 = vld [vmem:[%s216_s28 + $0x30] sm:$0xff]  ;;  %v2172_v12 = vld [vmem:[%s216_s28 + $0x40] sm:$0xff]  ;;  %1657 = vmatprep.mubr.msk.f32.mxu0 %vm1999_vm0, %v2000_v56  ;;  %1619 = vmatprep.mubr.msk.f32.mxu1 %vm1999_vm0, %v2000_v56  ;;  %vm340_vm4 = vcmask 326912   ;;  %vm347_vm5 = vcmask 392512   ;;  %vm354_vm6 = vcmask 458112  }
  0x3b   : > { %v2166_v9 = vld [vmem:[%s216_s28 + $0x38] sm:$0xff]  ;;  %260 = vadd.xlane.f32.xlu0 %v259_v3  ;;  %v262_v10 = vadd.f32 %v2160_v6, %v2158_v5  ;;  %v2174_v13 = vld [vmem:[%s216_s28 + $0x48] sm:$0xff]  ;;  %v2176_v14 = vld [vmem:[%s216_s28 + $0x50] sm:$0xff]  ;;  %vm361_vm7 = vcmask 523712   ;;  %vm363_vm8 = vcmask 523264   ;;  %vm910_vm9 = vcmask 1043456  }
  0x3c   : > { %266 = vadd.xlane.f32.xlu1 %v265_v7  ;;  %v268_v11 = vadd.f32 %v2166_v9, %v2164_v8  ;;  %v2178_v15 = vld [vmem:[%s216_s28 + $0x58] sm:$0xff]  ;;  %v271_v16 = vadd.f32 %v2174_v13, %v2172_v12  ;;  %v2184_v18 = vld [vmem:[%s216_s28 + $0x60] sm:$0xff]  ;;  %v2186_v19 = vld [vmem:[%s216_s28 + $0x68] sm:$0xff]  ;;  %vm906_vm10 = vcmask 31744   ;;  %s2365_s10 = scalar_lea.vmem [#allocation5], %s1527_s25  ;;  %s1536_s25 = sshll.u32 %s2055_s22, 11 }
  0x3d   : > { %v274_v17 = vadd.f32 %v2178_v15, %v2176_v14  ;;  %v2188_v20 = vld [vmem:[%s216_s28 + $0x70] sm:$0xff]  ;;  %v2190_v21 = vld [vmem:[%s216_s28 + $0x78] sm:$0xff]  ;;  %v277_v22 = vadd.f32 %v2186_v19, %v2184_v18  ;;  %v291_v24 = vld [vmem:[%s2447_s1] sm:$0xff]  ;;  %s1447_s11 = sshll.u32 %s2365_s10, 4  ;;  %s2396_s26 = scalar_lea.hbm %s2451_s5, %s1536_s25  ;;  %s2398_s11 = int_to_ptr.vmem [resolvable:$true] %s1447_s11 }
  0x3e   : > { %v280_v23 = vadd.f32 %v2190_v21, %v2188_v20  ;;  %v292_v25 = vld [vmem:[%s2447_s1 + $0x8] sm:$0xff]  ;;  %v367_v26 = vand.u32 4294901760, %v291_v24  ;;  %v293_v30 = vld [vmem:[%s2447_s1 + $0x10] sm:$0xff]  ;;  %v294_v31 = vld [vmem:[%s2447_s1 + $0x18] sm:$0xff]  ;;  %s1434_s22 = scalar_lea.sflag [#allocation4], %s2138_s23  ;;  %s1927_s28 = scalar_lea.vmem %s2398_s11, 2048 }
  0x3f   : > { %263 = vadd.xlane.f32.xlu0 %v262_v10  ;;  %v370_v27 = vand.u32 4294901760, %v292_v25  ;;  %v373_v33 = vand.u32 4294901760, %v293_v30  ;;  %v376_v35 = vand.u32 4294901760, %v294_v31  ;;  %v295_v38 = vld [vmem:[%s2447_s1 + $0x20] sm:$0xff]  ;;  %v296_v39 = vld [vmem:[%s2447_s1 + $0x28] sm:$0xff]  ;;  %v297_v46 = vld [vmem:[%s2447_s1 + $0x30] sm:$0xff]  ;;  %p1928_p6 = scmp.ne.s32.totalorder %s2398_s11, %s1927_s28 }
  0x40   : > { %269 = vadd.xlane.f32.xlu1 %v268_v11  ;;  %v2202_v28 = vsub.f32 %v291_v24, %v367_v26  ;;  %v379_v40 = vand.u32 4294901760, %v295_v38  ;;  %v382_v41 = vand.u32 4294901760, %v296_v39  ;;  %v298_v47 = vld [vmem:[%s2447_s1 + $0x38] sm:$0xff]  ;;  %v385_v48 = vand.u32 4294901760, %v297_v46  ;;  %p2458_p11 = scmp.ne.s32.totalorder %s2455_s30, 0  ;;  %s2001_s29 = smov [#allocation5]  }
  0x41   : > { %v2204_v29 = vsub.f32 %v292_v25, %v370_v27  ;;  %v2216_v36 = vsub.f32 %v293_v30, %v373_v33  ;;  %v2219_v37 = vsub.f32 %v294_v31, %v376_v35  ;;  %v2229_v43 = vpack.c.bf16 %v370_v27, %v367_v26  ;;  %s1931_s12 = sshll.u32 %s2001_s29, 4  ;;  %s1932_s12 = int_to_ptr.vmem [resolvable:$false] %s1931_s12 }
  0x42   : > { %v479_v44 = vsub.f32 %v295_v38, %v379_v40  ;;  %v486_v45 = vsub.f32 %v296_v39, %v382_v41  ;;  %v388_v50 = vand.u32 4294901760, %v298_v47  ;;  %v2240_v51 = vpack.c.bf16 %v376_v35, %v373_v33  ;;  %p1929_p12 = pnand %p1928_p6, %p2458_p11  ;;  %s1933_s14 = scalar_lea.vmem %s1932_s12, 4096 }
  0x43   : > { %272 = vadd.xlane.f32.xlu0 %v271_v16  ;;  %v1772_v32 = vpack.c.bf16 %v2204_v29, %v2202_v28  ;;  %v1775_v42 = vpack.c.bf16 %v2219_v37, %v2216_v36  ;;  %1749 = vmatpush3.bf16.msra.mxu1 %v2229_v43  ;;  %v493_v52 = vsub.f32 %v297_v46, %v385_v48  ;;  %v452_v57 = vand.u32 4294901760, %v2202_v28  ;;  %p1934_p8 = scmp.lt.s32.totalorder %s2398_s11, %s1932_s12  ;;  %p1935_p10 = scmp.lt.s32.totalorder %s1933_s14, %s1927_s28 }
  0x44   : > { %275 = vadd.xlane.f32.xlu1 %v274_v17  ;;  %v1778_v49 = vpack.c.bf16 %v486_v45, %v479_v44  ;;  %1750 = vmatprep.subr.bf16.mxu1 %v1998_v34  ;;  %v500_v53 = vsub.f32 %v298_v47, %v388_v50  ;;  %v2244_v54 = vpack.c.bf16 %v382_v41, %v379_v40  ;;  %v459_v58 = vand.u32 4294901760, %v2204_v29  ;;  %p1930_p13 = pneg %p1929_p12 }
  0x45   : > { %1773 = vmatpush3.bf16.msra.mxu0 %v1772_v32  ;;  %v2256_v59 = vpack.c.bf16 %v388_v50, %v385_v48  ;;  %v453_v60 = vsub.f32 %v2202_v28, %v452_v57  ;;  %v466_v3 = vand.u32 4294901760, %v2216_v36  ;;  %v473_v7 = vand.u32 4294901760, %v2219_v37  ;;  %p1936_p0 = por %p1935_p10, %p1934_p8 }
  0x46   : > { %1774 = vmatprep.subr.bf16.mxu0 %v1998_v34  ;;  %v1781_v55 = vpack.c.bf16 %v500_v53, %v493_v52  ;;  %v460_v61 = vsub.f32 %v2204_v29, %v459_v58  ;;  %v487_v24 = vand.u32 4294901760, %v486_v45  ;;  %v494_v30 = vand.u32 4294901760, %v493_v52 }
  0x47   : > { %278 = vadd.xlane.f32.xlu0 %v277_v22  ;;  %1752 = vmatpush3.bf16.msra.mxu1 %v2240_v51  ;;  %v454_v62 = vand.u32 4294901760, %v453_v60  ;;  %v467_v11 = vsub.f32 %v2216_v36, %v466_v3  ;;  %v474_v16 = vsub.f32 %v2219_v37, %v473_v7  ;;  %v501_v31 = vand.u32 4294901760, %v500_v53  ;;  %p1937_p2 = pnand %p1936_p0, %p1930_p13 }
  0x48   : > { %281 = vadd.xlane.f32.xlu1 %v280_v23  ;;  %1753 = vmatprep.subr.bf16.mxu1 %v1998_v34  ;;  %v461_v63 = vand.u32 4294901760, %v460_v61  ;;  %v480_v23 = vand.u32 4294901760, %v479_v44  ;;  %v488_v27 = vsub.f32 %v486_v45, %v487_v24  ;;  %v495_v33 = vsub.f32 %v493_v52, %v494_v30 }
  0x49   : > { %1776 = vmatpush3.bf16.msra.mxu0 %v1775_v42  ;;  %v468_v17 = vand.u32 4294901760, %v467_v11  ;;  %v475_v22 = vand.u32 4294901760, %v474_v16  ;;  %v502_v35 = vsub.f32 %v500_v53, %v501_v31  ;;  %v2272_v38 = vpack.c.bf16 %v459_v58, %v452_v57 }
  0x4a   : > { %1777 = vmatprep.subr.bf16.mxu0 %v1998_v34  ;;  %v2264_v10 = vpack.c.bf16 %v461_v63, %v454_v62  ;;  %v481_v26 = vsub.f32 %v479_v44, %v480_v23  ;;  %v489_v29 = vand.u32 4294901760, %v488_v27  ;;  %v496_v36 = vand.u32 4294901760, %v495_v33 }
  0x4b   : > { %1755 = vmatpush3.bf16.msra.mxu1 %v2244_v54  ;;  %v2268_v25 = vpack.c.bf16 %v475_v22, %v468_v17  ;;  %v503_v37 = vand.u32 4294901760, %v502_v35  ;;  %v2276_v40 = vpack.c.bf16 %v473_v7, %v466_v3  ;;  %v2278_v41 = vpack.c.bf16 %v487_v24, %v480_v23 }
  0x4c   : > { %1756 = vmatprep.subr.bf16.mxu1 %v1998_v34  ;;  %v482_v28 = vand.u32 4294901760, %v481_v26  ;;  %v2280_v42 = vpack.c.bf16 %v501_v31, %v494_v30  ;;  %v308_v44 = vlaneseq }
  0x4d   : > { %1779 = vmatpush3.bf16.msra.mxu0 %v1778_v49  ;;  %v2274_v39 = vpack.c.bf16 %v503_v37, %v496_v36 }
  0x4e   : > { %1780 = vmatprep.subr.bf16.mxu0 %v1998_v34  ;;  %v2270_v32 = vpack.c.bf16 %v489_v29, %v482_v28  ;;  %v309_v45 = vand.u32 127, %v308_v44  ;;  %v2282_v46 = vshrl.u32 %v308_v44, 7 }
  0x4f   : > { %1758 = vmatpush3.bf16.msra.mxu1 %v2256_v59 }
  0x50   : > { %1759 = vmatprep.subr.bf16.mxu1 %v1998_v34  ;;  %v314_v47 = vadd.s32 4294967288, %v309_v45  ;;  %v321_v49 = vadd.s32 4294967280, %v309_v45  ;;  %v328_v50 = vadd.s32 4294967272, %v309_v45  ;;  %v312_v53 = vsub.s32 %v309_v45, %v2282_v46 }
  0x51   : > { %1782 = vmatpush3.bf16.msra.mxu0 %v1781_v55  ;;  %v335_v58 = vadd.s32 4294967264, %v309_v45  ;;  %v342_v3 = vadd.s32 4294967256, %v309_v45  ;;  %v349_v24 = vadd.s32 4294967248, %v309_v45  ;;  %v356_v30 = vadd.s32 4294967240, %v309_v45 }
  0x52   : > { %1783 = vmatprep.subr.bf16.mxu0 %v1998_v34  ;;  %v317_v57 = vsub.s32 %v314_v47, %v2282_v46  ;;  %v324_v60 = vsub.s32 %v321_v49, %v2282_v46  ;;  %v331_v63 = vsub.s32 %v328_v50, %v2282_v46 }
  0x53   : > { %v338_v23 = vsub.s32 %v335_v58, %v2282_v46  ;;  %v345_v29 = vsub.s32 %v342_v3, %v2282_v46 }
  0xc8   : > { %v261_v48 = vpop.xlane.xlu0 %260 }
  0xc9   : > { %v267_v52 = vpop.xlane.xlu1 %266  ;;  %v283_v55 = vmul.f32 0.00390625, %v261_v48  ;;  %v352_v48 = vsub.s32 %v349_v24, %v2282_v46 }
  0xca   : > { %v285_v61 = vmul.f32 0.00390625, %v267_v52  ;;  %v359_v52 = vsub.s32 %v356_v30, %v2282_v46 }
  0xcb   : > { %v313_v17 = vrot.slane %v283_v55, %v312_v53 }
  0xcc   : > { %v264_v62 = vpop.xlane.xlu0 %263  ;;  %v325_v26 = vrot.slane %v285_v61, %v324_v60 }
  0xcd   : > { %v284_v7 = vmul.f32 0.00390625, %v264_v62  ;;  %v270_v11 = vpop.xlane.xlu1 %269 }
  0xce   : > { %v286_v16 = vmul.f32 0.00390625, %v270_v11 }
  0xcf   : > { %v318_v22 = vrot.slane %v284_v7, %v317_v57 }
  0xd0   : > { %v332_v27 = vrot.slane %v286_v16, %v331_v63  ;;  %v273_v28 = vpop.xlane.xlu0 %272 }
  0xd1   : > { %v320_v31 = vsel %vm319_vm1, %v318_v22, %v313_v17  ;;  %v287_v33 = vmul.f32 0.00390625, %v273_v28  ;;  %v276_v35 = vpop.xlane.xlu1 %275 }
  0xd2   : > { %v327_v36 = vsel %vm326_vm2, %v325_v26, %v320_v31  ;;  %v288_v37 = vmul.f32 0.00390625, %v276_v35 }
  0xd3   : > { %v334_v44 = vsel %vm333_vm3, %v332_v27, %v327_v36  ;;  %v339_v47 = vrot.slane %v287_v33, %v338_v23  ;;  %v905_v33 = vld [vmem:[%s2450_s4] sm:$0x1] }
  0xd4   : > { %v346_v49 = vrot.slane %v288_v37, %v345_v29  ;;  %v279_v50 = vpop.xlane.xlu0 %278 }
  0xd5   : > { %v341_v53 = vsel %vm340_vm4, %v339_v47, %v334_v44  ;;  %v289_v55 = vmul.f32 0.00390625, %v279_v50  ;;  %v282_v57 = vpop.xlane.xlu1 %281 }
  0xd6   : > { %v290_v45 = vmul.f32 0.00390625, %v282_v57  ;;  %v348_v60 = vsel %vm347_vm5, %v346_v49, %v341_v53  ;;  %v1368_v49 = vsub.s32 0, %v2282_v46 }
  0xd7   : > { %v353_v58 = vrot.slane %v289_v55, %v352_v48 }
  0xd8   : > { %v360_v61 = vrot.slane %v290_v45, %v359_v52 }
  0xd9   : > { %v355_v62 = vsel %vm354_vm6, %v353_v58, %v348_v60 }
  0xda   : > { %v362_v63 = vsel %vm361_vm7, %v360_v61, %v355_v62 }
  0xdb   : > { %v364_v3 = vsel %vm363_vm8, %v362_v63, 0 }
  0xdc   : > { %v439_v7 = vand.u32 4294901760, %v364_v3 }
  0xde   : > { %v440_v11 = vsub.f32 %v364_v3, %v439_v7 }
  0xe0   : > { %1658 = vmatmul.mubr.f32.vlgmr.msra.gmra.mrb[0].mxu0 %v440_v11  ;;  %v441_v16 = vand.u32 4294901760, %v440_v11 }
  0xe1   : > { %1785 = vmatpush3.bf16.msra.mxu0 %v2229_v43  ;;  %1676 = vmatprep.mubr.msk.f32.mxu0 %vm1999_vm0, %v2000_v56 }
  0xe2   : > { %1786 = vmatprep.subr.bf16.mxu0 %v1998_v34  ;;  %v442_v17 = vsub.f32 %v440_v11, %v441_v16 }
  0xe4   : > { %v443_v22 = vand.u32 4294901760, %v442_v17 }
  0xe5   : > { %1788 = vmatpush3.bf16.msra.mxu0 %v2240_v51 }
  0xe6   : > { %1620 = vmatmul.mubr.f32.vlgmr.msra.gmra.mrb[0].mxu1 %v443_v22  ;;  %1789 = vmatprep.subr.bf16.mxu0 %v1998_v34 }
  0xe7   : > { %1761 = vmatpush3.bf16.msra.mxu1 %v2264_v10  ;;  %1638 = vmatprep.mubr.msk.f32.mxu1 %vm1999_vm0, %v2000_v56 }
  0xe8   : > { %1762 = vmatprep.subr.bf16.mxu1 %v1998_v34 }
  0xe9   : > { %1791 = vmatpush3.bf16.msra.mxu0 %v2244_v54 }
  0xea   : > { %1792 = vmatprep.subr.bf16.mxu0 %v1998_v34 }
  0xeb   : > { %1764 = vmatpush3.bf16.msra.mxu1 %v2268_v25 }
  0xec   : > { %1765 = vmatprep.subr.bf16.mxu1 %v1998_v34 }
  0xed   : > { %1794 = vmatpush3.bf16.msra.mxu0 %v2256_v59 }
  0xee   : > { %1795 = vmatprep.subr.bf16.mxu0 %v1998_v34 }
  0xef   : > { %1767 = vmatpush3.bf16.msra.mxu1 %v2270_v32 }
  0xf0   : > { %1677 = vmatmul.mubr.f32.vlgmr.msra.gmra.mrb[0].mxu0 %v441_v16  ;;  %1768 = vmatprep.subr.bf16.mxu1 %v1998_v34 }
  0xf1   : > { %1797 = vmatpush3.bf16.msra.mxu0 %v2272_v38  ;;  %1695 = vmatprep.mubr.msk.f32.mxu0 %vm1999_vm0, %v2000_v56 }
  0xf2   : > { %1798 = vmatprep.subr.bf16.mxu0 %v1998_v34 }
  0xf3   : > { %1770 = vmatpush3.bf16.msra.mxu1 %v2274_v39 }
  0xf4   : > { %1717 = vmatprep.subr.mxu1 %v2000_v56 }
  0xf5   : > { %1800 = vmatpush3.bf16.msra.mxu0 %v2276_v40 }
  0xf6   : > { %1639 = vmatmul.mubr.f32.vlgmr.msra.gmra.mrb[0].mxu1 %v439_v7  ;;  %1801 = vmatprep.subr.bf16.mxu0 %v1998_v34 }
  0xf7   : > { %1719 = vmatprep.mubr.msk.f32.mxu1 %vm1999_vm0, %v2000_v56 }
  0xf9   : > { %1803 = vmatpush3.bf16.msra.mxu0 %v2278_v41 }
  0xfa   : > { %1804 = vmatprep.subr.bf16.mxu0 %v1998_v34 }
  0xfd   : > { %1806 = vmatpush3.bf16.msra.mxu0 %v2280_v42 }
  0xfe   : > { %1807 = vmatprep.subr.bf16.mxu0 %v1998_v34 }
 0x100   : > { %1696 = vmatmul.mubr.f32.vlgmr.msra.gmra.mrb[0].mxu0 %v439_v7 }
 0x101   : > { %1809 = vmatpush3.bf16.msra.mxu0 %v2229_v43  ;;  %1714 = vmatprep.mubr.msk.f32.mxu0 %vm1999_vm0, %v2000_v56  ;;  %v904_v43 = vld [vmem:[%s2449_s3] sm:$0xf] }
 0x102   : > { %1810 = vmatprep.subr.bf16.mxu0 %v1998_v34  ;;  %v912_v10 = vsel %vm910_vm9, %v904_v43, 0 }
 0x103   : > { %v915_v25 = vand.u32 4294901760, %v912_v10 }
 0x105   : > { %1812 = vmatpush3.bf16.msra.mxu0 %v2240_v51  ;;  %1718 = vmatpush3.msra.mxu1 %v915_v25  ;;  %v992_v40 = vsub.f32 %v912_v10, %v915_v25 }
 0x106   : > { %1813 = vmatprep.subr.bf16.mxu0 %v1998_v34  ;;  %1722 = vmatprep.subr.mxu1 %v2000_v56 }
 0x107   : > { %v993_v23 = vand.u32 4294901760, %v992_v40 }
 0x109   : > { %1815 = vmatpush3.bf16.msra.mxu0 %v2244_v54  ;;  %v299_v54 = vld [vmem:[%s2448_s2] sm:$0x1]  ;;  %v994_v27 = vsub.f32 %v992_v40, %v993_v23 }
 0x10a   : > { %1816 = vmatprep.subr.bf16.mxu0 %v1998_v34 }
 0x10b   : > { %v995_v30 = vand.u32 4294901760, %v994_v27 }
 0x10d   : > { %1818 = vmatpush3.bf16.msra.mxu0 %v2256_v59 }
 0x110   : > { %1715 = vmatmul.mubr.f32.vlgmr.msra.gmra.mrb[0].mxu0 %v439_v7 }
 0x1c9   : > { %v556_v51 = vpop.f32.mrb[0].mxu1 }
 0x1ca   : > { %v1640_v32 = vpop.f32.mrb[1].mxu1  ;;  %v1819_v34 = vadd.f32 %v556_v51, %v299_v54 }
 0x1e3   : > { %v899_v38 = vpop.f32.mrb[0].mxu0 }
 0x1e4   : > { %v1820_v59 = vadd.f32 %v1819_v34, %v899_v38  ;;  %v1716_v39 = vpop.f32.mrb[1].mxu0 }
 0x1e6   : > { %v903_v41 = vmax.f32 %v1820_v59, 0.0 }
 0x1e8   : > { %v908_v42 = vsel %vm906_vm10, %v903_v41, 0 }
 0x1e9   : > { %v980_v24 = vand.u32 4294901760, %v908_v42 }
 0x1eb   : > { %v981_v26 = vsub.f32 %v908_v42, %v980_v24 }
 0x1ed   : > { %v982_v28 = vand.u32 4294901760, %v981_v26 }
 0x1ef   : > { %v983_v29 = vsub.f32 %v981_v26, %v982_v28 }
 0x1f1   : > { %v984_v31 = vand.u32 4294901760, %v983_v29 }
 0x1f3   : > { %1720 = vmatmul.mubr.f32.vlgmr.msra.gmra.mrb[2].mxu1 %v984_v31 }
 0x1f4   : > { %1723 = vmatpush3.msra.mxu1 %v995_v30  ;;  %1724 = vmatprep.mubr.msk.f32.mxu1 %vm1999_vm0, %v2000_v56 }
 0x1f5   : > { %1727 = vmatprep.subr.mxu1 %v2000_v56 }
 0x1fb   : > { %1725 = vmatmul.mubr.f32.vlgmr.msra.gmra.mrb[2].mxu1 %v980_v24 }
 0x1fc   : > { %1728 = vmatpush3.msra.mxu1 %v992_v40  ;;  %1729 = vmatprep.mubr.msk.f32.mxu1 %vm1999_vm0, %v2000_v56 }
 0x1fd   : > { %1732 = vmatprep.subr.mxu1 %v2000_v56 }
 0x203   : > { %1730 = vmatmul.mubr.f32.vlgmr.msra.gmra.mrb[2].mxu1 %v981_v26 }
 0x204   : > { %1733 = vmatpush3.msra.mxu1 %v915_v25  ;;  %1734 = vmatprep.mubr.msk.f32.mxu1 %vm1999_vm0, %v2000_v56 }
 0x205   : > { %1737 = vmatprep.subr.mxu1 %v2000_v56 }
 0x20b   : > { %1735 = vmatmul.mubr.f32.vlgmr.msra.gmra.mrb[2].mxu1 %v982_v28 }
 0x20c   : > { %1738 = vmatpush3.msra.mxu1 %v993_v23  ;;  %1739 = vmatprep.mubr.msk.f32.mxu1 %vm1999_vm0, %v2000_v56 }
 0x20d   : > { %1742 = vmatprep.subr.mxu1 %v2000_v56 }
 0x213   : > { %1740 = vmatmul.mubr.f32.vlgmr.msra.gmra.mrb[2].mxu1 %v980_v24 }
 0x214   : > { %1743 = vmatpush3.msra.mxu1 %v915_v25  ;;  %1744 = vmatprep.mubr.msk.f32.mxu1 %vm1999_vm0, %v2000_v56 }
 0x21b   : > { %1745 = vmatmul.mubr.f32.vlgmr.msra.gmra.mrb[2].mxu1 %v980_v24 }
 0x2ee   : > { %v1356_v35 = vpop.f32.mrb[2].mxu1 }
 0x2ef   : > { %v1821_v36 = vadd.f32 %v1356_v35, %v905_v33  ;;  %v1746_v37 = vpop.f32.mrb[3].mxu1 }
 0x2f1   : > { %v1529_v44 = vmul.f32 -1.442695, %v1821_v36 }
 0x2f3   : > { %1893 = vpow2.f32 %v1529_v44 }
 0x2fd   : > { %v1894_v47 = vpop.eup %1893 }
 0x2fe   : > { %v1363_v48 = vadd.f32 1.0, %v1894_v47 }
 0x300   : > { %1895 = vrcp.f32 %v1363_v48 }
 0x30a   : > { %v1896_v50 = vpop.eup %1895 }
 0x30b   : > { %v1369_v52 = vrot.slane %v1896_v50, %v1368_v49 }
 0x30d   : > { %1375 = vbcast.lane.b32.xlu1 %v1369_v52, 264  ;;  %1371 = vbcast.lane.b32.xlu0 %v1369_v52, 256 }
 0x311   : > { %1379 = vbcast.lane.b32.xlu1 %v1369_v52, 272  ;;  %1387 = vbcast.lane.b32.xlu0 %v1369_v52, 288 }
 0x315   : > { %1383 = vbcast.lane.b32.xlu1 %v1369_v52, 280  ;;  %1395 = vbcast.lane.b32.xlu0 %v1369_v52, 304 }
 0x319   : > { %1391 = vbcast.lane.b32.xlu1 %v1369_v52, 296 }
 0x31d   : > { %1399 = vbcast.lane.b32.xlu1 %v1369_v52, 312 }
 0x37f   : > { %v1376_v56 = vpop.permute.xlu1 %1375  ;;  %v1372_v53 = vpop.permute.xlu0 %1371 }
 0x380   : > { %v1403_v55 = vmul.f32 %v1376_v56, %v2158_v5  ;;  %v1404_v57 = vmul.f32 %v1376_v56, %v2160_v6  ;;  %v1401_v45 = vmul.f32 %v1372_v53, %v2148_v0  ;;  %v1402_v46 = vmul.f32 %v1372_v53, %v2150_v1 }
 0x382   : > { %1419 = vst [vmem:[%s2365_s10 + $0x10] sm:$0xff] %v1403_v55  ;;  %1420 = vst [vmem:[%s2365_s10 + $0x18] sm:$0xff] %v1404_v57 }
 0x383   : > { %1417 = vst [vmem:[%s2365_s10] sm:$0xff] %v1401_v45  ;;  %1418 = vst [vmem:[%s2365_s10 + $0x8] sm:$0xff] %v1402_v46  ;;  %v1380_v5 = vpop.permute.xlu1 %1379  ;;  %v1388_v0 = vpop.permute.xlu0 %1387 }
 0x384   : > { %v1405_v1 = vmul.f32 %v1380_v5, %v2152_v2  ;;  %v1406_v6 = vmul.f32 %v1380_v5, %v2156_v4  ;;  %v1409_v58 = vmul.f32 %v1388_v0, %v2172_v12  ;;  %v1410_v60 = vmul.f32 %v1388_v0, %v2174_v13 }
 0x386   : > { %1421 = vst [vmem:[%s2365_s10 + $0x20] sm:$0xff] %v1405_v1  ;;  %1422 = vst [vmem:[%s2365_s10 + $0x28] sm:$0xff] %v1406_v6 }
 0x387   : > { %1425 = vst [vmem:[%s2365_s10 + $0x40] sm:$0xff] %v1409_v58  ;;  %1426 = vst [vmem:[%s2365_s10 + $0x48] sm:$0xff] %v1410_v60  ;;  %v1384_v61 = vpop.permute.xlu1 %1383  ;;  %v1396_v62 = vpop.permute.xlu0 %1395 }
 0x388   : > { %v1407_v2 = vmul.f32 %v1384_v61, %v2164_v8  ;;  %v1408_v63 = vmul.f32 %v1384_v61, %v2166_v9  ;;  %v1413_v4 = vmul.f32 %v1396_v62, %v2184_v18  ;;  %v1414_v12 = vmul.f32 %v1396_v62, %v2186_v19 }
 0x38a   : > { %1423 = vst [vmem:[%s2365_s10 + $0x30] sm:$0xff] %v1407_v2  ;;  %1424 = vst [vmem:[%s2365_s10 + $0x38] sm:$0xff] %v1408_v63 }
 0x38b   : > { %1429 = vst [vmem:[%s2365_s10 + $0x60] sm:$0xff] %v1413_v4  ;;  %1430 = vst [vmem:[%s2365_s10 + $0x68] sm:$0xff] %v1414_v12  ;;  %v1392_v13 = vpop.permute.xlu1 %1391 }
 0x38c   : > { %v1411_v3 = vmul.f32 %v1392_v13, %v2176_v14  ;;  %v1412_v7 = vmul.f32 %v1392_v13, %v2178_v15 }
 0x38e   : > { %1427 = vst [vmem:[%s2365_s10 + $0x50] sm:$0xff] %v1411_v3  ;;  %1428 = vst [vmem:[%s2365_s10 + $0x58] sm:$0xff] %v1412_v7 }
 0x38f   : > { %v1400_v8 = vpop.permute.xlu1 %1399 }
 0x390   : > { %v1415_v9 = vmul.f32 %v1400_v8, %v2188_v20  ;;  %v1416_v14 = vmul.f32 %v1400_v8, %v2190_v21 }
 0x392   : > { %1431 = vst [vmem:[%s2365_s10 + $0x70] sm:$0xff] %v1415_v9  ;;  %1432 = vst [vmem:[%s2365_s10 + $0x78] sm:$0xff] %v1416_v14 }
 0x393   : > { %1940 = shalt.err (!%p1937_p2)
}
 0x394   : > { %s1941_s15 = scalar_lea.hbm %s2396_s26, 2048  ;;  %s1945_s7 = scalar_lea.hbm %s2451_s5, 4096 }
 0x395   : > { %p1942_p4 = scmp.ne.s32.totalorder %s2396_s26, %s1941_s15  ;;  %p1946_p9 = scmp.lt.u32.totalorder %s2396_s26, %s2451_s5 }
 0x396   : > { %p1947_p1 = scmp.lt.u32.totalorder %s1945_s7, %s1941_s15  ;;  %p1949_p6 = scmp.lt.u32.totalorder %s1941_s15, %s2396_s26 }
 0x397   : > { %p1943_p5 = pnand %p1942_p4, %p2458_p11 }
 0x398   : > { %p1948_p3 = por %p1947_p1, %p1946_p9 }
 0x399   : > { %p1944_p7 = pneg %p1943_p5 }
 0x39a   : > { %p1950_p12 = por %p1949_p6, %p1948_p3 }
 0x39c   : > { %p1951_p13 = pnand %p1950_p12, %p1944_p7 }
 0x39e   : > { %1954 = shalt.err (!%p1951_p13)
}
 0x39f   : > { %s2002_s25 = smov 256   ;;  %s2003_s13 = smov 16  }
 0x3a0   : > { %1842 = dma.vmem_to_hbm [thread:$0]  (%p2458_p11), %s2398_s11, 2048, %s2396_s26, %s1434_s22, %s2002_s25, %s2002_s25, %s2003_s13  }
 0x3a1 PF: > { %s1462_s17 = sand.u32 1, %s1981_s18   ;;  %p2459_p8 = scmp.ne.s32.totalorder %s2456_s6, 0 }
 0x3a2   : > { %p2460_p10 = scmp.ge.s32.totalorder %s1993_s21, 2  ;;  %s1463_s28 = scalar_lea.sflag [#allocation4], %s1462_s17 }
 0x3a4   : > { %p1849_p0 = pnand %p2460_p10, %p2459_p8 }
 0x3a6   : > { %1976 = dma.done.wait (!%p1849_p0), %s1463_s28, 2048  }
 0x3a7   : > { %1978 = vsyncadd (!%p1849_p0), %s1463_s28, 4294965248  ;;  %p18_p2 = scmp.ge.s32.totalorder %s2059_s24, 4   ;;  %s2461_s18 = smov %s1985_s19 }
 0x3a8   : > { %s2462_s19 = smov %s1989_s20  ;;  %s2463_s20 = smov %s2071_s27 }
 0x3a9   : > { %s2464_s21 = smov %s2059_s24  ;;  %20 = sbr.rel (!%p18_p2) target bundleno = 5 (0x5), region = 85 }
 0x3b0   :  { %1468 = vsyncpa [#allocation3], 1 }
 0x3b1   :  { %1470 = vsyncpa [#allocation3 + $0x1], 1 }
 0x3b2   :  { %1471 = vsyncpa [#allocation4], 1 }
 0x3b3   :  { %1473 = vsyncpa [#allocation4 + $0x1], 1 }

</bundles_post_ra>
